<compile_context>
chip_gen: v6e
topology: v6e:2x2x1
jax: 0.10.0
libtpu: 0.0.40
codegen_flags: <defaults>
</compile_context>

<pallas_src>
import functools

import jax
import jax.numpy as jnp
from jax import lax
from jax.experimental import pallas as pl
from jax.experimental.pallas import tpu as pltpu


def _round_up(x: int, m: int) -> int:
    return ((x + m - 1) // m) * m


def _linear_kernel(x_ref, w_ref, b_ref, o_ref):
    # x_ref : (tm, H)      bf16 in VMEM
    # w_ref : (C_pad, H)   bf16 in VMEM  (PyTorch layout, NOT transposed)
    # b_ref : (1, C_pad)   f32  in VMEM
    # o_ref : (tm, C_pad)  f32
    acc = lax.dot_general(
        x_ref[...], w_ref[...],
        dimension_numbers=(((1,), (1,)), ((), ())),   # contract H with H
        preferred_element_type=jnp.float32,
    )
    o_ref[...] = (acc + b_ref[...]).astype(o_ref.dtype)


def prepare_linear_params(weight, bias, compute_dtype=jnp.bfloat16):
    """One-time (out of the hot path) padding + cast of the Linear params.

    weight: (C, H)  PyTorch nn.Linear layout
    bias:   (C,)
    Returns (w_padded[C_pad, H] bf16, b_padded[1, C_pad] f32, C).
    """
    C, H = weight.shape
    C_pad = max(128, _round_up(C, 128))          # lane-dense output dimension
    w_p = jnp.pad(weight, ((0, C_pad - C), (0, 0))).astype(compute_dtype)
    b_p = jnp.pad(bias.astype(jnp.float32), (0, C_pad - C)).reshape(1, C_pad)
    return w_p, b_p, C


@functools.partial(jax.jit, static_argnames=("num_labels",))
def tail_linear(x, w_padded, b_padded, num_labels):
    """y = x @ weight.T + bias  (nn.Linear semantics), Pallas TPU kernel."""
    B, H = x.shape
    C_pad, H2 = w_padded.shape
    assert H == H2

    # Batch tile: multiple of 16 (bf16 sublane packing), capped at 256 so each
    # block feeds the 256-wide MXU on v6e/v7x (also a multiple of 128 for v5e).
    tm = 256 if B >= 256 else _round_up(B, 16)
    B_pad = _round_up(B, tm)

    x_p = x
    if B_pad != B:
        x_p = jnp.pad(x, ((0, B_pad - B), (0, 0)))
    x_p = x_p.astype(w_padded.dtype)             # bf16 activations -> half HBM traffic

    out_padded = pl.pallas_call(
        _linear_kernel,
        out_shape=jax.ShapeDtypeStruct((B_pad, C_pad), jnp.float32),
        grid_spec=pltpu.PrefetchScalarGridSpec(
            num_scalar_prefetch=0,
            grid=(B_pad // tm,),                 # grid over batch only; full K=H per block
            in_specs=[
                pl.BlockSpec((tm, H), lambda i: (i, 0)),       # x tile, pipelined
                pl.BlockSpec((C_pad, H), lambda i: (0, 0)),    # weight resident
                pl.BlockSpec((1, C_pad), lambda i: (0, 0)),    # bias resident
            ],
            out_specs=pl.BlockSpec((tm, C_pad), lambda i: (i, 0)),
        ),
        compiler_params=pltpu.CompilerParams(
            # batch axis is independent -> shard across the 2 TCs on v7x
            dimension_semantics=("parallel",),
        ),
    )(x_p, w_padded, b_padded)

    # Slice the lane-padded slab back to the logical (B, C) result.
    return out_padded[:B, :num_labels]


def network_forward(batch, w_padded, b_padded, num_labels):
    # head == identity (opaque in reference); tail == single Linear.
    head_out = batch
    return tail_linear(head_out, w_padded, b_padded, num_labels)


if __name__ == "__main__":
    # Small shapes implied by the module: batch of 8 examples, hidden_size=32,
    # number of distinct labels = 10.
    B, H, C = 8, 32, 10

    key = jax.random.PRNGKey(0)
    kx, kw, kb = jax.random.split(key, 3)

    x = jax.random.normal(kx, (B, H), dtype=jnp.float32)

    # Deterministic PyTorch-style Linear init: U(-1/sqrt(H), 1/sqrt(H)).
    bound = 1.0 / jnp.sqrt(jnp.float32(H))
    weight = jax.random.uniform(kw, (C, H), jnp.float32, -bound, bound)
    bias = jax.random.uniform(kb, (C,), jnp.float32, -bound, bound)

    # Parameter prep (pad + bf16 cast) happens once, outside the hot path.
    w_p, b_p, num_labels = prepare_linear_params(weight, bias)

    out = network_forward(x, w_p, b_p, num_labels)
    out = jax.block_until_ready(out)
    assert out.shape == (B, C)

    # Reference 1: emulate the bf16 input rounding with f32 accumulation
    # (matches the kernel's numerics) -> tight tolerance.
    xb = x.astype(jnp.bfloat16).astype(jnp.float32)
    wb = weight.astype(jnp.bfloat16).astype(jnp.float32)
    ref_bf16 = xb @ wb.T + bias
    assert jnp.allclose(out, ref_bf16, atol=1e-5, rtol=1e-5)

    # Reference 2: pure-f32 nn.Linear -> loose tolerance (bf16 input rounding).
    ref_f32 = x @ weight.T + bias
    assert jnp.allclose(out, ref_f32, atol=5e-2, rtol=5e-2)

    print("KERNEL_OK")
</pallas_src>

<mosaic_0001>
module attributes {stable_mosaic.version = 11 : i64} {
  func.func @_linear_kernel(%arg0: i32, %arg1: memref<16x32xbf16, #tpu.memory_space<vmem>>, %arg2: memref<128x32xbf16, #tpu.memory_space<vmem>>, %arg3: memref<1x128xf32, #tpu.memory_space<vmem>>, %arg4: memref<16x128xf32, #tpu.memory_space<vmem>>) attributes {dimension_semantics = [#tpu.dimension_semantics<parallel>], iteration_bounds = array<i64: 1>, scalar_prefetch = 0 : i64, scratch_operands = 0 : i64, tpu.core_type = #tpu.core_type<tc>, window_params = [{transform_indices = @transform_0, window_bounds = array<i64: 16, 32>}, {pipeline_mode = #tpu.pipeline_mode<synchronous>, transform_indices = @transform_1, window_bounds = array<i64: 128, 32>}, {pipeline_mode = #tpu.pipeline_mode<synchronous>, transform_indices = @transform_2, window_bounds = array<i64: 1, 128>}, {transform_indices = @transform_3, window_bounds = array<i64: 16, 128>}]} {
    %c0 = arith.constant 0 : index
    %c0_0 = arith.constant 0 : index
    %0 = vector.load %arg1[%c0, %c0_0] : memref<16x32xbf16, #tpu.memory_space<vmem>>, vector<16x32xbf16>
    %c0_1 = arith.constant 0 : index
    %c0_2 = arith.constant 0 : index
    %1 = vector.load %arg2[%c0_1, %c0_2] : memref<128x32xbf16, #tpu.memory_space<vmem>>, vector<128x32xbf16>
    %cst = arith.constant dense<0.000000e+00> : vector<16x128xf32>
    %2 = tpu.matmul %0, %1, %cst {dimension_numbers = #tpu.dot_dimension_numbers<[1], [1], [0], [0], [0, 0, 1, 0], [], []>} : vector<16x32xbf16>, vector<128x32xbf16>, vector<16x128xf32> -> vector<16x128xf32>
    %c0_3 = arith.constant 0 : index
    %c0_4 = arith.constant 0 : index
    %3 = vector.load %arg3[%c0_3, %c0_4] : memref<1x128xf32, #tpu.memory_space<vmem>>, vector<1x128xf32>
    %4 = vector.broadcast %3 : vector<1x128xf32> to vector<16x128xf32>
    %5 = arith.addf %2, %4 : vector<16x128xf32>
    %c0_5 = arith.constant 0 : index
    %c0_6 = arith.constant 0 : index
    %6 = vector.load %arg4[%c0_5, %c0_6] : memref<16x128xf32, #tpu.memory_space<vmem>>, vector<16x128xf32>
    tpu.vector_store %arg4[%c0_5, %c0_6], %5 {strides = array<i32>} : memref<16x128xf32, #tpu.memory_space<vmem>>, vector<16x128xf32>,
    return
  }
  func.func @transform_0(%arg0: i32) -> (i32, i32) {
    %c0_i32 = arith.constant 0 : i32
    %c0_i32_0 = arith.constant 0 : i32
    return %arg0, %c0_i32 : i32, i32
  }
  func.func @transform_1(%arg0: i32) -> (i32, i32) {
    %c0_i32 = arith.constant 0 : i32
    %c0_i32_0 = arith.constant 0 : i32
    %c0_i32_1 = arith.constant 0 : i32
    return %c0_i32, %c0_i32_0 : i32, i32
  }
  func.func @transform_2(%arg0: i32) -> (i32, i32) {
    %c0_i32 = arith.constant 0 : i32
    %c0_i32_0 = arith.constant 0 : i32
    %c0_i32_1 = arith.constant 0 : i32
    return %c0_i32, %c0_i32_0 : i32, i32
  }
  func.func @transform_3(%arg0: i32) -> (i32, i32) {
    %c0_i32 = arith.constant 0 : i32
    %c0_i32_0 = arith.constant 0 : i32
    return %arg0, %c0_i32 : i32, i32
  }
}

</mosaic_0001>

<bundles_post_ra>
// kernel: tail_linear.1
= control target key start
LH: loop header
LB: loop body
LE: loop exit
PB: predicated region body
PF: predicated region fallthrough
CT: control target
= control target key end

     0   :  { %vm85_vm0 = vcmask 261120   ;;  %v211_v0 = vmov 0.0   ;;  %vm212_vm1 = vmmov 0   ;;  %s278_s1 = inlined_call_operand.vmem [shape: bf16[128,32], index: 1, kind: input, shape index: {}]   ;;  %s279_s0 = inlined_call_operand.vmem [shape: bf16[16,32], index: 0, kind: input, shape index: {}]   ;;  %s280_s2 = inlined_call_operand.vmem [shape: f32[1,128], index: 2, kind: input, shape index: {}]   ;;  %s281_s3 = inlined_call_operand.vmem [shape: f32[16,128], index: 3, kind: output, shape index: {}]  }
   0x1   :  { %180 = vmatprep.subr.bf16.mxu0 %v211_v0  ;;  %v202_v1 = vld [vmem:[%s278_s1 + $0x38] sm:$0xff]   ;;  %196 = vmatprep.mubr.msk.bf16.mxu0 %vm212_vm1, %v211_v0  ;;  %v203_v3 = vld [vmem:[%s278_s1 + $0x30] sm:$0xff]   ;;  %v204_v5 = vld [vmem:[%s278_s1 + $0x28] sm:$0xff]  }
   0x2   :  { %v111_v2 = vsel %vm85_vm0, %v202_v1, 0  ;;  %v108_v4 = vsel %vm85_vm0, %v203_v3, 0  ;;  %v105_v6 = vsel %vm85_vm0, %v204_v5, 0  ;;  %v205_v7 = vld [vmem:[%s278_s1 + $0x20] sm:$0xff]   ;;  %v206_v9 = vld [vmem:[%s278_s1 + $0x18] sm:$0xff]   ;;  %v207_v11 = vld [vmem:[%s278_s1 + $0x10] sm:$0xff]  }
   0x3   :  { %181 = vmatpush3.bf16.xpose.msra.mxu0 %v111_v2  ;;  %v102_v8 = vsel %vm85_vm0, %v205_v7, 0  ;;  %v99_v10 = vsel %vm85_vm0, %v206_v9, 0  ;;  %v96_v12 = vsel %vm85_vm0, %v207_v11, 0  ;;  %v208_v13 = vld [vmem:[%s278_s1 + $0x8] sm:$0xff]   ;;  %v209_v15 = vld [vmem:[%s278_s1] sm:$0xff]  }
   0x4   :  { %182 = vmatprep.subr.bf16.mxu0 %v211_v0  ;;  %v93_v14 = vsel %vm85_vm0, %v208_v13, 0  ;;  %v90_v16 = vsel %vm85_vm0, %v209_v15, 0  ;;  %v210_v17 = vld [vmem:[%s279_s0] sm:$0xff]  }
   0x5   :  { %v160_v18 = vld [vmem:[%s280_s2] ss:$0 sm:$0xff] }
   0xb   :  { %183 = vmatpush3.bf16.xpose.msra.mxu0 %v108_v4 }
   0xc   :  { %184 = vmatprep.subr.bf16.mxu0 %v211_v0 }
  0x13   :  { %185 = vmatpush3.bf16.xpose.msra.mxu0 %v105_v6 }
  0x14   :  { %186 = vmatprep.subr.bf16.mxu0 %v211_v0 }
  0x1b   :  { %187 = vmatpush3.bf16.xpose.msra.mxu0 %v102_v8 }
  0x1c   :  { %188 = vmatprep.subr.bf16.mxu0 %v211_v0 }
  0x23   :  { %189 = vmatpush3.bf16.xpose.msra.mxu0 %v99_v10 }
  0x24   :  { %190 = vmatprep.subr.bf16.mxu0 %v211_v0 }
  0x2b   :  { %191 = vmatpush3.bf16.xpose.msra.mxu0 %v96_v12 }
  0x2c   :  { %192 = vmatprep.subr.bf16.mxu0 %v211_v0 }
  0x33   :  { %193 = vmatpush3.bf16.xpose.msra.mxu0 %v93_v14 }
  0x34   :  { %194 = vmatprep.subr.bf16.mxu0 %v211_v0 }
  0x3b   :  { %195 = vmatpush3.bf16.xpose.msra.mxu0 %v90_v16 }
  0x42   :  { %197 = vmatmul.mubr.msk.bf16.vlgmr.msra.gmra.mxu0 %vm85_vm0, %v210_v17 }
 0x102   :  { %v147_v19 = vpop.f32.mrf.mxu0 }
 0x103   :  { %v148_v20 = vadd.f32 %v160_v18, %v147_v19 }
 0x104   :  { %v198_v21 = vpop.f32.mrf.mxu0 }
 0x105   :  { %154 = vst [vmem:[%s281_s3] sm:$0xff] %v148_v20 }
 0x106   :  { %v150_v22 = vpop.f32.mrf.mxu0 }
 0x107   :  { %v151_v23 = vadd.f32 %v160_v18, %v150_v22 }
 0x108   :  { %v199_v24 = vpop.f32.mrf.mxu0 }
 0x109   :  { %155 = vst [vmem:[%s281_s3 + $0x8] sm:$0xff] %v151_v23 }

</bundles_post_ra>
